<compile_context>
chip_gen: v5e
topology: v5e:2x2
jax: 0.10.0
libtpu: 0.0.40
codegen_flags: <defaults>
</compile_context>

<pallas_src>
import functools

import jax
import jax.numpy as jnp
from jax.experimental import pallas as pl
from jax.experimental.pallas import tpu as pltpu


def _round_up(x, m):
    return ((x + m - 1) // m) * m


def news_encoder_kernel(emb_ref, q_ref, wcat_ref, convb_ref, attw_ref,
                        attb_ref, out_ref, *, Bb, N, T, Tp_pad, W, F_pad):
    """One block of Bb batch elements per grid step.

    emb_ref  : (Bb, N, Tp_pad, E)   bf16  padded word embeddings
    q_ref    : (Bb, 1, A_pad)       f32   personalized query (zero-padded)
    wcat_ref : (E, W*F_pad)         bf16  conv weight, windows concatenated
    convb_ref: (1, F_pad)           f32   conv bias (zero-padded)
    attw_ref : (F_pad, A_pad)       bf16  attention projection weight
    attb_ref : (1, A_pad)           f32   attention projection bias
    out_ref  : (Bb, N, F_pad)       f32   pooled news representation
    """
    E = emb_ref.shape[-1]
    A = attw_ref.shape[-1]
    M = Bb * N

    # ---- Conv1d ("same") as ONE MXU matmul over all Tp rows -------------
    # r[m, tp, w*F_pad + f] = emb_p[m, tp, :] @ conv_w[f, :, w]
    x = emb_ref[...].reshape(M * Tp_pad, E)                        # bf16, free reshape
    r = jnp.dot(x, wcat_ref[...], preferred_element_type=jnp.float32)
    r3 = r.reshape(M, Tp_pad, W * F_pad)                           # f32

    # shift-sum: conv[m, t, f] = sum_w r3[m, t + w, w*F_pad + f]
    conv = r3[:, 0:T, 0:F_pad]
    for w in range(1, W):                                          # W small & static
        conv = conv + r3[:, w:w + T, w * F_pad:(w + 1) * F_pad]

    rep = jnp.maximum(conv.reshape(M * T, F_pad) + convb_ref[...], 0.0)  # ReLU, f32

    # ---- Personalized attentive pooling ----------------------------------
    att = jnp.tanh(
        jnp.dot(rep.astype(jnp.bfloat16), attw_ref[...],
                preferred_element_type=jnp.float32) + attb_ref[...])     # (M*T, A)
    att3 = att.reshape(Bb, N * T, A)
    scores = jnp.sum(att3 * q_ref[...], axis=-1)                   # (Bb, N*T)
    scores = scores.reshape(M, T)                                  # softmax over T

    m_max = jnp.max(scores, axis=-1, keepdims=True)
    ex = jnp.exp(scores - m_max)
    denom = jnp.sum(ex, axis=-1, keepdims=True)
    alphas = ex * pl.reciprocal(denom, approx=True)                # (M, T)

    rep3 = rep.reshape(M, T, F_pad)
    pooled = jnp.sum(rep3 * alphas[:, :, None], axis=1)            # (M, F_pad)
    out_ref[...] = pooled.reshape(Bb, N, F_pad).astype(out_ref.dtype)


@functools.partial(jax.jit, static_argnames=("window_size", "block_b"))
def news_encoder_forward(indices, query, params, *, window_size, block_b=None):
    """indices: (B, N, T) int32, query: (B, A) float32 -> (B, N, F) float32."""
    emb_table = params["emb_table"]       # (V, E)
    conv_w = params["conv_w"]             # (F, E, W)  PyTorch Conv1d layout
    conv_b = params["conv_b"]             # (F,)
    att_w = params["att_w"]               # (F, A)
    att_b = params["att_b"]               # (A,)

    B, N, T = indices.shape
    E = emb_table.shape[1]
    F = conv_w.shape[0]
    A = att_w.shape[1]
    W = window_size
    assert W % 2 == 1, "even window_size differs from PyTorch Conv1d('same') semantics"
    pad_l = (W - 1) // 2                  # "same" padding (output length == T)
    Tp = T + W - 1
    Tp_pad = _round_up(Tp, 8)             # sublane-friendly: in-kernel reshapes are free
    F_pad = _round_up(F, 128)             # lane-dense output / matmul N-dims
    A_pad = _round_up(A, 128)
    WF = W * F_pad

    if block_b is None:
        # Keep >=2 grid steps (v7x has 2 TensorCores) and keep the double-
        # buffered bf16 emb block far under v7x's 64 MiB VMEM (32 MiB scoped).
        budget = 8 * 1024 * 1024
        per_b = N * Tp_pad * max(E, 128) * 2          # lane-padded bf16 bytes
        block_b = max(1, min(max(B // 2, 1), budget // max(per_b, 1)))
        while B % block_b != 0:
            block_b -= 1
    assert B % block_b == 0

    # ---- JAX glue: gather + "same" padding + weight re-layout -------------
    emb = jnp.take(emb_table, indices.reshape(-1), axis=0).reshape(B, N, T, E)
    emb_p = jnp.pad(emb, ((0, 0), (0, 0), (pad_l, Tp_pad - T - pad_l), (0, 0)))
    emb_p = emb_p.astype(jnp.bfloat16)                 # halves HBM bytes

    wk = jnp.transpose(conv_w, (2, 1, 0))              # (W, E, F)
    wk = jnp.pad(wk, ((0, 0), (0, 0), (0, F_pad - F)))
    wcat = jnp.transpose(wk, (1, 0, 2)).reshape(E, WF).astype(jnp.bfloat16)
    convb = jnp.pad(conv_b, (0, F_pad - F)).reshape(1, F_pad).astype(jnp.float32)
    attw = jnp.pad(att_w, ((0, F_pad - F), (0, A_pad - A))).astype(jnp.bfloat16)
    attb = jnp.pad(att_b, (0, A_pad - A)).reshape(1, A_pad).astype(jnp.float32)
    q3 = jnp.pad(query.astype(jnp.float32),
                 ((0, 0), (0, A_pad - A))).reshape(B, 1, A_pad)

    kernel = functools.partial(news_encoder_kernel, Bb=block_b, N=N, T=T,
                               Tp_pad=Tp_pad, W=W, F_pad=F_pad)

    flops = 2 * B * N * (Tp_pad * E * WF + T * F_pad * A_pad)
    transcendentals = B * N * T * (A_pad + 2)          # tanh + exp + approx recip
    bytes_accessed = (emb_p.size * 2 + wcat.size * 2 + attw.size * 2
                      + (convb.size + attb.size + q3.size) * 4
                      + B * N * F_pad * 4)

    out = pl.pallas_call(
        kernel,
        out_shape=jax.ShapeDtypeStruct((B, N, F_pad), jnp.float32),
        grid_spec=pltpu.PrefetchScalarGridSpec(
            num_scalar_prefetch=0,
            grid=(B // block_b,),
            in_specs=[
                pl.BlockSpec((block_b, N, Tp_pad, E), lambda b: (b, 0, 0, 0)),
                pl.BlockSpec((block_b, 1, A_pad), lambda b: (b, 0, 0)),
                pl.BlockSpec((E, WF), lambda b: (0, 0)),
                pl.BlockSpec((1, F_pad), lambda b: (0, 0)),
                pl.BlockSpec((F_pad, A_pad), lambda b: (0, 0)),
                pl.BlockSpec((1, A_pad), lambda b: (0, 0)),
            ],
            out_specs=pl.BlockSpec((block_b, N, F_pad), lambda b: (b, 0, 0)),
        ),
        compiler_params=pltpu.CompilerParams(
            dimension_semantics=("parallel",)),
        cost_estimate=pl.CostEstimate(flops=int(flops),
                                      transcendentals=int(transcendentals),
                                      bytes_accessed=int(bytes_accessed)),
    )(emb_p, q3, wcat, convb, attw, attb)

    return out[:, :, :F]                               # drop lane padding


def reference_forward(indices, query, params, *, window_size):
    """Pure-JAX f32 replica of the PyTorch forward (eval mode)."""
    emb = params["emb_table"][indices]                         # (B, N, T, E)
    B, N, T, E = emb.shape
    W = window_size
    pad = (W - 1) // 2
    x = emb.reshape(B * N, T, E).transpose(0, 2, 1)            # (BN, E, T)
    xp = jnp.pad(x, ((0, 0), (0, 0), (pad, W - 1 - pad)))
    F = params["conv_w"].shape[0]
    out = jnp.zeros((B * N, F, T), jnp.float32)
    for w in range(W):
        out = out + jnp.einsum('bet,fe->bft', xp[:, :, w:w + T],
                               params["conv_w"][:, :, w])
    out = out + params["conv_b"][None, :, None]
    out = jnp.maximum(out, 0.0)
    repz = out.reshape(B, N, F, T).transpose(0, 1, 3, 2)       # (B, N, T, F)
    att = jnp.tanh(jnp.einsum('bntf,fa->bnta', repz, params["att_w"])
                   + params["att_b"])
    scores = jnp.einsum('bnta,ba->bnt', att, query)
    alphas = jax.nn.softmax(scores, axis=-1)
    return jnp.einsum('bnt,bntf->bnf', alphas, repz)


if __name__ == "__main__":
    # Small hparams: vocab=50, word_emb_dim=32, filter_num=16,
    #                window_size=3, attention_hidden_dim=8
    B, N, T = 2, 3, 8
    V, E, F, W, A = 50, 32, 16, 3, 8

    key = jax.random.PRNGKey(0)
    k_emb, k_cw, k_cb, k_aw, k_ab, k_idx, k_q = jax.random.split(key, 7)
    params = {
        "emb_table": jax.random.normal(k_emb, (V, E), jnp.float32) * 0.1,
        "conv_w": jax.random.normal(k_cw, (F, E, W), jnp.float32) * 0.1,
        "conv_b": jax.random.normal(k_cb, (F,), jnp.float32) * 0.1,
        "att_w": jax.random.normal(k_aw, (F, A), jnp.float32) * 0.1,
        "att_b": jax.random.normal(k_ab, (A,), jnp.float32) * 0.1,
    }
    batch_news_indices = jax.random.randint(k_idx, (B, N, T), 0, V,
                                            dtype=jnp.int32)
    batch_query = jax.random.normal(k_q, (B, A), jnp.float32)

    out = news_encoder_forward(batch_news_indices, batch_query, params,
                               window_size=W)
    out = jax.block_until_ready(out)

    ref = reference_forward(batch_news_indices, batch_query, params,
                            window_size=W)
    assert out.shape == (B, N, F)
    # bf16 matmul inputs + approx reciprocal: compare against the f32
    # reference with a correspondingly relaxed tolerance.
    max_err = jnp.max(jnp.abs(out - ref))
    assert jnp.allclose(out, ref, rtol=1e-2, atol=1e-2), f"max err {max_err}"
    print("KERNEL_OK")
</pallas_src>

<mosaic_0001>
module attributes {stable_mosaic.version = 11 : i64} {
  func.func @news_encoder_kernel(%arg0: i32, %arg1: memref<1x3x16x32xbf16, #tpu.memory_space<vmem>>, %arg2: memref<1x1x128xf32, #tpu.memory_space<vmem>>, %arg3: memref<32x384xbf16, #tpu.memory_space<vmem>>, %arg4: memref<1x128xf32, #tpu.memory_space<vmem>>, %arg5: memref<128x128xbf16, #tpu.memory_space<vmem>>, %arg6: memref<1x128xf32, #tpu.memory_space<vmem>>, %arg7: memref<1x3x128xf32, #tpu.memory_space<vmem>>) attributes {dimension_semantics = [#tpu.dimension_semantics<parallel>], iteration_bounds = array<i64: 2>, scalar_prefetch = 0 : i64, scratch_operands = 0 : i64, tpu.core_type = #tpu.core_type<tc>, window_params = [{transform_indices = @transform_0, window_bounds = array<i64: 1, 3, 16, 32>}, {transform_indices = @transform_1, window_bounds = array<i64: 1, 1, 128>}, {pipeline_mode = #tpu.pipeline_mode<synchronous>, transform_indices = @transform_2, window_bounds = array<i64: 32, 384>}, {pipeline_mode = #tpu.pipeline_mode<synchronous>, transform_indices = @transform_3, window_bounds = array<i64: 1, 128>}, {pipeline_mode = #tpu.pipeline_mode<synchronous>, transform_indices = @transform_4, window_bounds = array<i64: 128, 128>}, {pipeline_mode = #tpu.pipeline_mode<synchronous>, transform_indices = @transform_5, window_bounds = array<i64: 1, 128>}, {transform_indices = @transform_6, window_bounds = array<i64: 1, 3, 128>}]} {
    %c0 = arith.constant 0 : index
    %c0_0 = arith.constant 0 : index
    %c0_1 = arith.constant 0 : index
    %c0_2 = arith.constant 0 : index
    %0 = vector.load %arg1[%c0, %c0_0, %c0_1, %c0_2] : memref<1x3x16x32xbf16, #tpu.memory_space<vmem>>, vector<1x3x16x32xbf16>
    %1 = vector.shape_cast %0 : vector<1x3x16x32xbf16> to vector<48x32xbf16>
    %c0_3 = arith.constant 0 : index
    %c0_4 = arith.constant 0 : index
    %2 = vector.load %arg3[%c0_3, %c0_4] : memref<32x384xbf16, #tpu.memory_space<vmem>>, vector<32x384xbf16>
    %cst = arith.constant dense<0.000000e+00> : vector<48x384xf32>
    %3 = tpu.matmul %1, %2, %cst {dimension_numbers = #tpu.dot_dimension_numbers<[1], [0], [0], [1], [0, 0, 1, 1], [], []>} : vector<48x32xbf16>, vector<32x384xbf16>, vector<48x384xf32> -> vector<48x384xf32>
    %4 = vector.shape_cast %3 : vector<48x384xf32> to vector<3x16x384xf32>
    %5 = vector.extract_strided_slice %4 {offsets = [0, 0, 0], sizes = [3, 8, 128], strides = [1, 1, 1]} : vector<3x16x384xf32> to vector<3x8x128xf32>
    %6 = vector.extract_strided_slice %4 {offsets = [0, 1, 128], sizes = [3, 8, 128], strides = [1, 1, 1]} : vector<3x16x384xf32> to vector<3x8x128xf32>
    %7 = arith.addf %5, %6 : vector<3x8x128xf32>
    %8 = vector.extract_strided_slice %4 {offsets = [0, 2, 256], sizes = [3, 8, 128], strides = [1, 1, 1]} : vector<3x16x384xf32> to vector<3x8x128xf32>
    %9 = arith.addf %7, %8 : vector<3x8x128xf32>
    %10 = vector.shape_cast %9 : vector<3x8x128xf32> to vector<24x128xf32>
    %c0_5 = arith.constant 0 : index
    %c0_6 = arith.constant 0 : index
    %11 = vector.load %arg4[%c0_5, %c0_6] : memref<1x128xf32, #tpu.memory_space<vmem>>, vector<1x128xf32>
    %12 = vector.broadcast %11 : vector<1x128xf32> to vector<24x128xf32>
    %13 = arith.addf %10, %12 : vector<24x128xf32>
    %cst_7 = arith.constant 0.000000e+00 : f32
    %14 = vector.broadcast %cst_7 : f32 to vector<24x128xf32>
    %15 = arith.maximumf %13, %14 : vector<24x128xf32>
    %16 = arith.truncf %15 : vector<24x128xf32> to vector<24x128xbf16>
    %c0_8 = arith.constant 0 : index
    %c0_9 = arith.constant 0 : index
    %17 = vector.load %arg5[%c0_8, %c0_9] : memref<128x128xbf16, #tpu.memory_space<vmem>>, vector<128x128xbf16>
    %cst_10 = arith.constant dense<0.000000e+00> : vector<24x128xf32>
    %18 = tpu.matmul %16, %17, %cst_10 {dimension_numbers = #tpu.dot_dimension_numbers<[1], [0], [0], [1], [0, 0, 1, 1], [], []>} : vector<24x128xbf16>, vector<128x128xbf16>, vector<24x128xf32> -> vector<24x128xf32>
    %c0_11 = arith.constant 0 : index
    %c0_12 = arith.constant 0 : index
    %19 = vector.load %arg6[%c0_11, %c0_12] : memref<1x128xf32, #tpu.memory_space<vmem>>, vector<1x128xf32>
    %20 = vector.broadcast %19 : vector<1x128xf32> to vector<24x128xf32>
    %21 = arith.addf %18, %20 : vector<24x128xf32>
    %22 = math.tanh %21 : vector<24x128xf32>
    %23 = vector.shape_cast %22 : vector<24x128xf32> to vector<1x24x128xf32>
    %c0_13 = arith.constant 0 : index
    %c0_14 = arith.constant 0 : index
    %c0_15 = arith.constant 0 : index
    %24 = vector.load %arg2[%c0_13, %c0_14, %c0_15] : memref<1x1x128xf32, #tpu.memory_space<vmem>>, vector<1x1x128xf32>
    %25 = vector.broadcast %24 : vector<1x1x128xf32> to vector<1x24x128xf32>
    %26 = arith.mulf %23, %25 : vector<1x24x128xf32>
    %cst_16 = arith.constant dense<0.000000e+00> : vector<1x24xf32>
    %27 = vector.multi_reduction <add>, %26, %cst_16 [2] : vector<1x24x128xf32> to vector<1x24xf32>
    %28 = vector.shape_cast %27 : vector<1x24xf32> to vector<3x8xf32>
    %cst_17 = arith.constant dense<0xFF800000> : vector<3xf32>
    %29 = vector.multi_reduction <maximumf>, %28, %cst_17 [1] : vector<3x8xf32> to vector<3xf32>
    %30 = vector.shape_cast %29 : vector<3xf32> to vector<3x1xf32>
    %31 = vector.broadcast %30 : vector<3x1xf32> to vector<3x8xf32>
    %32 = arith.subf %28, %31 : vector<3x8xf32>
    %33 = math.exp %32 : vector<3x8xf32>
    %cst_18 = arith.constant dense<0.000000e+00> : vector<3xf32>
    %34 = vector.multi_reduction <add>, %33, %cst_18 [1] : vector<3x8xf32> to vector<3xf32>
    %35 = vector.shape_cast %34 : vector<3xf32> to vector<3x1xf32>
    %36 = tpu.reciprocal %35 {approx = true} : vector<3x1xf32> -> vector<3x1xf32>
    %37 = vector.broadcast %36 : vector<3x1xf32> to vector<3x8xf32>
    %38 = arith.mulf %33, %37 : vector<3x8xf32>
    %39 = vector.shape_cast %15 : vector<24x128xf32> to vector<3x8x128xf32>
    %40 = vector.shape_cast %38 : vector<3x8xf32> to vector<3x8x1xf32>
    %41 = vector.broadcast %40 : vector<3x8x1xf32> to vector<3x8x128xf32>
    %42 = arith.mulf %39, %41 : vector<3x8x128xf32>
    %cst_19 = arith.constant dense<0.000000e+00> : vector<3x128xf32>
    %43 = vector.multi_reduction <add>, %42, %cst_19 [1] : vector<3x8x128xf32> to vector<3x128xf32>
    %44 = vector.shape_cast %43 : vector<3x128xf32> to vector<1x3x128xf32>
    %c0_20 = arith.constant 0 : index
    %c0_21 = arith.constant 0 : index
    %c0_22 = arith.constant 0 : index
    %45 = vector.load %arg7[%c0_20, %c0_21, %c0_22] : memref<1x3x128xf32, #tpu.memory_space<vmem>>, vector<1x3x128xf32>
    tpu.vector_store %arg7[%c0_20, %c0_21, %c0_22], %44 {strides = array<i32>} : memref<1x3x128xf32, #tpu.memory_space<vmem>>, vector<1x3x128xf32>,
    return
  }
  func.func @transform_0(%arg0: i32) -> (i32, i32, i32, i32) {
    %c0_i32 = arith.constant 0 : i32
    %c0_i32_0 = arith.constant 0 : i32
    %c0_i32_1 = arith.constant 0 : i32
    %c0_i32_2 = arith.constant 0 : i32
    return %arg0, %c0_i32, %c0_i32_0, %c0_i32_1 : i32, i32, i32, i32
  }
  func.func @transform_1(%arg0: i32) -> (i32, i32, i32) {
    %c0_i32 = arith.constant 0 : i32
    %c0_i32_0 = arith.constant 0 : i32
    %c0_i32_1 = arith.constant 0 : i32
    return %arg0, %c0_i32, %c0_i32_0 : i32, i32, i32
  }
  func.func @transform_2(%arg0: i32) -> (i32, i32) {
    %c0_i32 = arith.constant 0 : i32
    %c0_i32_0 = arith.constant 0 : i32
    %c0_i32_1 = arith.constant 0 : i32
    return %c0_i32, %c0_i32_0 : i32, i32
  }
  func.func @transform_3(%arg0: i32) -> (i32, i32) {
    %c0_i32 = arith.constant 0 : i32
    %c0_i32_0 = arith.constant 0 : i32
    %c0_i32_1 = arith.constant 0 : i32
    return %c0_i32, %c0_i32_0 : i32, i32
  }
  func.func @transform_4(%arg0: i32) -> (i32, i32) {
    %c0_i32 = arith.constant 0 : i32
    %c0_i32_0 = arith.constant 0 : i32
    %c0_i32_1 = arith.constant 0 : i32
    return %c0_i32, %c0_i32_0 : i32, i32
  }
  func.func @transform_5(%arg0: i32) -> (i32, i32) {
    %c0_i32 = arith.constant 0 : i32
    %c0_i32_0 = arith.constant 0 : i32
    %c0_i32_1 = arith.constant 0 : i32
    return %c0_i32, %c0_i32_0 : i32, i32
  }
  func.func @transform_6(%arg0: i32) -> (i32, i32, i32) {
    %c0_i32 = arith.constant 0 : i32
    %c0_i32_0 = arith.constant 0 : i32
    %c0_i32_1 = arith.constant 0 : i32
    return %arg0, %c0_i32, %c0_i32_0 : i32, i32, i32
  }
}

</mosaic_0001>

<bundles_post_ra>
// kernel: news_encoder_forward.1
= control target key start
LH: loop header
LB: loop body
LE: loop exit
PB: predicated region body
PF: predicated region fallthrough
CT: control target
= control target key end

     0   :  { %s910_s21 = smov 0   ;;  %s1034_s0 = inlined_call_operand.vmem [shape: bf16[2,3,16,32], index: 0, kind: input, shape index: {}]   ;;  %s1035_s1 = inlined_call_operand.vmem [shape: f32[2,1,128], index: 1, kind: input, shape index: {}]   ;;  %s1036_s2 = inlined_call_operand.vmem [shape: bf16[32,384], index: 2, kind: input, shape index: {}]   ;;  %s1037_s3 = inlined_call_operand.vmem [shape: f32[1,128], index: 3, kind: input, shape index: {}]   ;;  %s1038_s4 = inlined_call_operand.vmem [shape: bf16[128,128], index: 4, kind: input, shape index: {}]   ;;  %s1039_s5 = inlined_call_operand.vmem [shape: f32[1,128], index: 5, kind: input, shape index: {}]   ;;  %s1040_s6 = inlined_call_operand.vmem [shape: f32[2,3,128], index: 6, kind: output, shape index: {}]  }
   0x1 LB: > { %s733_s22 = sadd.s32 4294967295, %s872_s21   ;;  %p737_p0 = scmp.ge.s32.totalorder %s872_s21, 1  ;;  %s872_s21 = sphi %s910_s21, %s16_s21  }
   0x2   : > { %p220_p1 = scmp.lt.s32.totalorder %s872_s21, 3 }
   0x4   : > { %p221_p2 = pnand %p737_p0, %p220_p1 }
   0x5   : > { %p252_p3 = scmp.lt.s32.totalorder (!%p221_p2), %s733_s22, 1 }
   0x6   : > { %224 = sbr.rel (%p221_p2) target bundleno = 975 (0x3cf), region = 44 }
   0xb   : > { %v825_v0 = vld [vmem:[%s1036_s2 + $0x1c] sm:$0xf]  ;;  %v768_v1 = vld [vmem:[%s1036_s2 + $0x24] sm:$0xf0]  ;;  %v774_v2 = vld [vmem:[%s1036_s2 + $0x20] sm:$0xf] }
   0xc   : > { %v771_v3 = vor.u32 %v825_v0, %v768_v1  ;;  %v827_v4 = vld [vmem:[%s1036_s2 + $0x28] sm:$0xf0]  ;;  %v822_v5 = vld [vmem:[%s1036_s2 + $0x4] sm:$0xf]  ;;  %v756_v6 = vld [vmem:[%s1036_s2 + $0xc] sm:$0xf0] }
   0xd   : > { %v775_v7 = vor.u32 %v827_v4, %v774_v2  ;;  %v762_v8 = vld [vmem:[%s1036_s2 + $0x8] sm:$0xf]  ;;  %v824_v9 = vld [vmem:[%s1036_s2 + $0x10] sm:$0xf0]  ;;  %v766_v10 = vld [vmem:[%s1036_s2 + $0x18] sm:$0xf]  ;;  %v759_v11 = vor.u32 %v822_v5, %v756_v6 }
   0xe   : > { %363 = vmatpush.bf16.msra.mxu1 %v771_v3  ;;  %v826_v12 = vld [vmem:[%s1036_s2 + $0x20] sm:$0xf0]  ;;  %v754_v13 = vld [vmem:[%s1036_s2] sm:$0xf]  ;;  %v763_v14 = vor.u32 %v824_v9, %v762_v8  ;;  %v823_v16 = vld [vmem:[%s1036_s2 + $0x8] sm:$0xf0] }
   0xf   : > { %387 = vmatpush.bf16.msra.mxu2 %v775_v7  ;;  %v767_v15 = vor.u32 %v826_v12, %v766_v10  ;;  %s1042_s22 = smov (!%p252_p3, %s733_s22), 1  ;;  %v755_v17 = vor.u32 %v823_v16, %v754_v13  ;;  %vm326_vm0 = vcmask 261120   ;;  %v835_v21 = vld [vmem:[%s1038_s4 + $0x38] sm:$0xff]  ;;  %v834_v22 = vld [vmem:[%s1038_s4 + $0x30] sm:$0xff]  ;;  %v833_v23 = vld [vmem:[%s1038_s4 + $0x28] sm:$0xff]  ;;  %vm411_vm1 = vcmask 1046528  }
  0x10   : > { %s836_s25 = smul.u32 24, %s1042_s22  ;;  %529 = vmatpush.bf16.msra.mxu3 %v835_v21  ;;  %v832_v24 = vld [vmem:[%s1038_s4 + $0x20] sm:$0xff]  ;;  %v831_v25 = vld [vmem:[%s1038_s4 + $0x18] sm:$0xff]  ;;  %v830_v26 = vld [vmem:[%s1038_s4 + $0x10] sm:$0xff]  ;;  %vm433_vm2 = vcmask 1045504   ;;  %s259_s27 = scalar_lea.vmem %s1035_s1, %s1042_s22  ;;  %vm571_vm3 = vcmask 1041409  }
  0x11   : > { %342 = vmatpush.bf16.msra.mxu0 %v767_v15  ;;  %v829_v29 = vld [vmem:[%s1038_s4 + $0x8] sm:$0xff]  ;;  %v828_v30 = vld [vmem:[%s1038_s4] sm:$0xff]  ;;  %vm573_vm4 = vcmask 1042434   ;;  %vm576_vm5 = vcmask 59392   ;;  %s739_s30 = sshll.u32 %s1042_s22, 2 }
  0x12   : > { %364 = vmatpush.bf16.msra.mxu1 %v759_v11  ;;  %s256_s28 = scalar_lea.vmem %s1034_s0, %s836_s25  ;;  %v849_v52 = vld [vmem:[%s1037_s3] ss:$0 sm:$0xff]  ;;  %s263_s9 = scalar_lea.vmem %s1040_s6, %s739_s30 }
  0x13   : > { %388 = vmatpush.bf16.msra.mxu2 %v763_v14  ;;  %v819_v18 = vld [vmem:[%s256_s28] sm:$0xff]  ;;  %v820_v19 = vld [vmem:[%s256_s28 + $0x8] sm:$0xff]  ;;  %v821_v20 = vld [vmem:[%s256_s28 + $0x10] sm:$0xff] }
  0x14   : > { %530 = vmatpush.bf16.msra.mxu3 %v834_v22  ;;  %v850_v16 = vld [vmem:[%s1039_s5] ss:$0 sm:$0xff] }
  0x15   : > { %343 = vmatpush.bf16.msra.mxu0 %v755_v17  ;;  %779 = vmatmul.msk.bf16.vlgmr.msra.gmra.mxu1 %vm326_vm0, %v819_v18 }
  0x16   : > { %782 = vmatmul.msk.bf16.vlgmr.msra.gmra.mxu2 %vm326_vm0, %v819_v18 }
  0x18   : > { %776 = vmatmul.msk.bf16.vlgmr.msra.gmra.mxu0 %vm326_vm0, %v819_v18  ;;  %531 = vmatpush.bf16.msra.mxu3 %v833_v23 }
  0x1c   : > { %532 = vmatpush.bf16.msra.mxu3 %v832_v24 }
  0x20   : > { %533 = vmatpush.bf16.msra.mxu3 %v831_v25 }
  0x24   : > { %534 = vmatpush.bf16.msra.mxu3 %v830_v26 }
  0x25   : > { %780 = vmatmul.msk.bf16.gmra.mxu1 %vm326_vm0, %v820_v19 }
  0x26   : > { %783 = vmatmul.msk.bf16.gmra.mxu2 %vm326_vm0, %v820_v19 }
  0x28   : > { %777 = vmatmul.msk.bf16.gmra.mxu0 %vm326_vm0, %v820_v19  ;;  %535 = vmatpush.bf16.msra.mxu3 %v829_v29  ;;  %v851_v19 = vld [vmem:[%s259_s27] ss:$0 sm:$0xff] }
  0x2c   : > { %536 = vmatpush.bf16.msra.mxu3 %v828_v30 }
  0x35   : > { %781 = vmatmul.msk.bf16.gmra.mxu1 %vm326_vm0, %v821_v20 }
  0x36   : > { %784 = vmatmul.msk.bf16.gmra.mxu2 %vm326_vm0, %v821_v20 }
  0x38   : > { %778 = vmatmul.msk.bf16.gmra.mxu0 %vm326_vm0, %v821_v20 }
  0x92   : > { %v366_v27 = vpop.f32.mrf.mxu1 }
  0x93   : > { %v412_v39 = vrot.slane %v366_v27, 1 }
  0x95   : > { %v345_v28 = vpop.f32.mrf.mxu0 }
  0x99   : > { %v390_v31 = vpop.f32.mrf.mxu2 }
  0x9a   : > { %v368_v32 = vpop.f32.mrf.mxu1  ;;  %v434_v42 = vrot.slane %v390_v31, 2 }
  0x9b   : > { %v413_v37 = vrot.slane %v368_v32, 1  ;;  %v566_v32 = vlaneseq }
  0x9d   : > { %v347_v33 = vpop.f32.mrf.mxu0  ;;  %v414_v43 = vsel %vm411_vm1, %v412_v39, %v413_v37 }
  0x9e   : > { %v424_v48 = vadd.f32 %v414_v43, %v345_v28 }
  0xa1   : > { %v392_v34 = vpop.f32.mrf.mxu2 }
  0xa2   : > { %v371_v35 = vpop.f32.mrf.mxu1  ;;  %v435_v40 = vrot.slane %v392_v34, 2  ;;  %v567_v34 = vand.u32 127, %v566_v32 }
  0xa3   : > { %v415_v47 = vrot.slane %v371_v35, 1 }
  0xa4   : > { %v436_v46 = vsel %vm433_vm2, %v434_v42, %v435_v40  ;;  %v874_v42 = vmov 0  }
  0xa5   : > { %v349_v36 = vpop.f32.mrf.mxu0  ;;  %v446_v51 = vadd.f32 %v436_v46, %v424_v48  ;;  %847 = vset.pattern.permute.xlu0 %v874_v42  ;;  %846 = vset.pattern.permute.xlu2 %v874_v42 }
  0xa6   : > { %848 = vset.pattern.permute.xlu1 %v874_v42 }
  0xa7   : > { %v991_v60 = vadd.f32 %v849_v52, %v446_v51 }
  0xa9   : > { %v395_v38 = vpop.f32.mrf.mxu2  ;;  %v456_v63 = vmax.f32 %v991_v60, 0.0 }
  0xaa   : > { %v373_v41 = vpop.f32.mrf.mxu1  ;;  %v437_v53 = vrot.slane %v395_v38, 2 }
  0xab   : > { %v416_v44 = vrot.slane %v373_v41, 1 }
  0xad   : > { %v351_v45 = vpop.f32.mrf.mxu0  ;;  %v417_v49 = vsel %vm411_vm1, %v415_v47, %v416_v44 }
  0xae   : > { %v425_v55 = vadd.f32 %v417_v49, %v349_v36 }
  0xb1   : > { %v397_v50 = vpop.f32.mrf.mxu2 }
  0xb2   : > { %v438_v54 = vrot.slane %v397_v50, 2  ;;  %v376_v56 = vpop.f32.mrf.mxu1 }
  0xb3   : > { %v418_v5 = vrot.slane %v376_v56, 1 }
  0xb4   : > { %v439_v57 = vsel %vm433_vm2, %v437_v53, %v438_v54 }
  0xb5   : > { %v353_v58 = vpop.f32.mrf.mxu0  ;;  %v447_v59 = vadd.f32 %v439_v57, %v425_v55 }
  0xb7   : > { %v993_v61 = vadd.f32 %v849_v52, %v447_v59 }
  0xb9   : > { %v400_v62 = vpop.f32.mrf.mxu2  ;;  %v457_v0 = vmax.f32 %v993_v61, 0.0 }
  0xba   : > { %v378_v1 = vpop.f32.mrf.mxu1  ;;  %v440_v8 = vrot.slane %v400_v62, 2 }
  0xbb   : > { %v459_v2 = vpack.c.bf16 %v457_v0, %v456_v63  ;;  %v419_v3 = vrot.slane %v378_v1, 1 }
  0xbd   : > { %v355_v4 = vpop.f32.mrf.mxu0  ;;  %537 = vmatmul.bf16.vlgmr.msra.gmra.mxu3 %v459_v2  ;;  %v420_v6 = vsel %vm411_vm1, %v418_v5, %v419_v3 }
  0xbe   : > { %v426_v10 = vadd.f32 %v420_v6, %v353_v58 }
  0xc1   : > { %v402_v7 = vpop.f32.mrf.mxu2 }
  0xc2   : > { %v441_v9 = vrot.slane %v402_v7, 2 }
  0xc4   : > { %v442_v11 = vsel %vm433_vm2, %v440_v8, %v441_v9 }
  0xc5   : > { %v448_v12 = vadd.f32 %v442_v11, %v426_v10 }
  0xc7   : > { %v455_v13 = vadd.f32 %v849_v52, %v448_v12 }
  0xc9   : > { %v1007_v14 = vmax.f32 %v455_v13, 0.0 }
  0xcb   : > { %v460_v15 = vpack.c.bf16 %v1007_v14, %v1007_v14 }
  0xcd   : > { %542 = vmatmul.bf16.gmra.mxu3 %v460_v15 }
 0x140   : > { %v538_v17 = vpop.f32.mrf.mxu3 }
 0x141   : > { %v539_v18 = vadd.f32 %v850_v16, %v538_v17 }
 0x143   : > { %852 = vtanh.f32 %v539_v18 }
 0x148   : > { %v540_v20 = vpop.f32.mrf.mxu3 }
 0x149   : > { %v853_v21 = vpop.eup %852  ;;  %v541_v22 = vadd.f32 %v850_v16, %v540_v20 }
 0x14a   : > { %v554_v23 = vmul.f32 %v853_v21, %v851_v19 }
 0x14b   : > { %854 = vtanh.f32 %v541_v22 }
 0x14c   : > { %557 = vadd.xlane.f32.xlu0 %v554_v23 }
 0x150   : > { %v543_v24 = vpop.f32.mrf.mxu3 }
 0x151   : > { %v855_v25 = vpop.eup %854  ;;  %v544_v26 = vadd.f32 %v850_v16, %v543_v24 }
 0x152   : > { %v555_v27 = vmul.f32 %v855_v25, %v851_v19 }
 0x153   : > { %856 = vtanh.f32 %v544_v26 }
 0x154   : > { %559 = vadd.xlane.f32.xlu0 %v555_v27 }
 0x158   : > { %v545_v28 = vpop.f32.mrf.mxu3 }
 0x159   : > { %v857_v29 = vpop.eup %856 }
 0x15a   : > { %v556_v30 = vmul.f32 %v857_v29, %v851_v19 }
 0x15c   : > { %561 = vadd.xlane.f32.xlu1 %v556_v30 }
 0x1bf   : > { %v558_v31 = vpop.xlane.xlu0 %557 }
 0x1c0   : > { %v568_v36 = vperm.slane %v558_v31, %v567_v34 }
 0x1c7   : > { %v560_v33 = vpop.xlane.xlu0 %559 }
 0x1c8   : > { %v569_v35 = vperm.slane %v560_v33, %v567_v34 }
 0x1ca   : > { %v572_v39 = vsel %vm571_vm3, %v569_v35, %v568_v36 }
 0x1cf   : > { %v562_v37 = vpop.xlane.xlu1 %561 }
 0x1d0   : > { %v570_v38 = vperm.slane %v562_v37, %v567_v34 }
 0x1d2   : > { %v574_v40 = vsel %vm573_vm4, %v570_v38, %v572_v39 }
 0x1d3   : > { %v577_v41 = vsel %vm576_vm5, %v574_v40, -inf }
 0x1d4   : > { %578 = vmax.xlane.f32.xlu1 %v577_v41 }
 0x247   : > { %v579_v43 = vpop.xlane.xlu1 %578 }
 0x248   : > { %v581_v44 = vperm.slane %v579_v43, 0  ;;  %v583_v45 = vperm.slane %v579_v43, 2  ;;  %v582_v48 = vperm.slane %v579_v43, 1 }
 0x24a   : > { %v587_v46 = vsub.f32 %v558_v31, %v581_v44  ;;  %v589_v47 = vsub.f32 %v562_v37, %v583_v45  ;;  %v588_v51 = vsub.f32 %v560_v33, %v582_v48 }
 0x24c   : > { %v590_v49 = vmul.f32 1.442695, %v587_v46  ;;  %v594_v50 = vmul.f32 1.442695, %v589_v47  ;;  %v592_v52 = vmul.f32 1.442695, %v588_v51 }
 0x24e   : > { %858 = vpow2.f32 %v594_v50 }
 0x24f   : > { %860 = vpow2.f32 %v590_v49 }
 0x250   : > { %862 = vpow2.f32 %v592_v52 }
 0x254   : > { %v859_v53 = vpop.eup %858 }
 0x255   : > { %v861_v54 = vpop.eup %860  ;;  %606 = vperm.xlu0 %847, %v859_v53  }
 0x256   : > { %600 = vperm.xlu2 %846, %v861_v54   ;;  %v863_v55 = vpop.eup %862 }
 0x25e   : > { %603 = vperm.xlu2 %846, %v863_v55  }
 0x2b0   : > { %v601_v56 = vpop.permute.xlu2 %600 }
 0x2b1   : > { %v608_v59 = vperm.slane %v601_v56, %v567_v34 }
 0x2b8   : > { %v604_v57 = vpop.permute.xlu2 %603 }
 0x2b9   : > { %v609_v58 = vperm.slane %v604_v57, %v567_v34 }
 0x2bb   : > { %v611_v2 = vsel %vm571_vm3, %v609_v58, %v608_v59 }
 0x2c7   : > { %v607_v62 = vpop.permute.xlu0 %606 }
 0x2c8   : > { %v610_v1 = vperm.slane %v607_v62, %v567_v34 }
 0x2ca   : > { %v612_v3 = vsel %vm573_vm4, %v610_v1, %v611_v2 }
 0x2cb   : > { %v614_v4 = vsel %vm576_vm5, %v612_v3, 0.0 }
 0x2cc   : > { %615 = vadd.xlane.f32.xlu1 %v614_v4 }
 0x33f   : > { %v616_v5 = vpop.xlane.xlu1 %615 }
 0x340   : > { %864 = vrcp.f32 %v616_v5 }
 0x346   : > { %v865_v6 = vpop.eup %864 }
 0x347   : > { %v620_v7 = vperm.slane %v865_v6, 1  ;;  %v619_v8 = vperm.slane %v865_v6, 0  ;;  %v621_v11 = vperm.slane %v865_v6, 2 }
 0x349   : > { %v626_v9 = vmul.f32 %v863_v55, %v620_v7  ;;  %v625_v10 = vmul.f32 %v861_v54, %v619_v8  ;;  %v627_v12 = vmul.f32 %v859_v53, %v621_v11 }
 0x34b   : > { %635 = vperm.xlu1 %848, %v626_v9   ;;  %630 = vperm.xlu2 %846, %v625_v10  }
 0x353   : > { %640 = vperm.xlu2 %846, %v627_v12  }
 0x3a5   : > { %v631_v13 = vpop.permute.xlu2 %630 }
 0x3a6   : > { %v643_v16 = vmul.f32 %v631_v13, %v456_v63 }
 0x3a8   : > { %v646_v18 = vrot.slane %v643_v16, 4 }
 0x3aa   : > { %v647_v20 = vadd.f32 %v646_v18, %v643_v16 }
 0x3ac   : > { %v648_v23 = vrot.slane %v647_v20, 2 }
 0x3ad   : > { %v641_v15 = vpop.permute.xlu2 %640 }
 0x3ae   : > { %v645_v17 = vmul.f32 %v641_v15, %v1007_v14  ;;  %v649_v27 = vadd.f32 %v648_v23, %v647_v20 }
 0x3b0   : > { %v658_v19 = vrot.slane %v645_v17, 4  ;;  %v650_v60 = vrot.slane %v649_v27, 1 }
 0x3b2   : > { %v659_v21 = vadd.f32 %v658_v19, %v645_v17  ;;  %v651_v32 = vadd.f32 %v650_v60, %v649_v27 }
 0x3b4   : > { %v660_v25 = vrot.slane %v659_v21, 2 }
 0x3b6   : > { %v661_v29 = vadd.f32 %v660_v25, %v659_v21 }
 0x3b8   : > { %v662_v31 = vrot.slane %v661_v29, 1 }
 0x3ba   : > { %v663_v34 = vadd.f32 %v662_v31, %v661_v29 }
 0x3bd   : > { %v636_v22 = vpop.permute.xlu1 %635 }
 0x3be   : > { %v644_v24 = vmul.f32 %v636_v22, %v457_v0 }
 0x3c0   : > { %v652_v26 = vrot.slane %v644_v24, 4 }
 0x3c2   : > { %v653_v28 = vadd.f32 %v652_v26, %v644_v24 }
 0x3c4   : > { %v654_v30 = vrot.slane %v653_v28, 2 }
 0x3c6   : > { %v655_v63 = vadd.f32 %v654_v30, %v653_v28 }
 0x3c8   : > { %v656_v14 = vrot.slane %v655_v63, 1 }
 0x3ca   : > { %v657_v33 = vadd.f32 %v656_v14, %v655_v63 }
 0x3cc   : > { %v667_v61 = vsel %vm571_vm3, %v657_v33, %v651_v32 }
 0x3cd   : > { %v668_v0 = vsel %vm573_vm4, %v663_v34, %v667_v61 }
 0x3ce   : > { %670 = vst [vmem:[%s263_s9] sm:$0x7] %v668_v0 }
 0x3cf PF: > { %s16_s21 = sadd.s32 1, %s872_s21  }
 0x3d0   : > { %p13_p4 = scmp.ge.s32.totalorder %s16_s21, 4  }
 0x3d2   :  { %15 = sbr.rel (!%p13_p4) target bundleno = 1 (0x1), region = 77 }

</bundles_post_ra>
